<compile_context>
chip_gen: v5e
topology: v5e:2x2
jax: 0.10.0
libtpu: 0.0.40
codegen_flags: <defaults>
</compile_context>

<pallas_src>
import jax
import jax.numpy as jnp
from jax.experimental import pallas as pl
from jax.experimental.pallas import tpu as pltpu


# ---------------------------------------------------------------------------
# Kernel 1: dh = d * (x @ W1 + b1), row-blocked, emitted in bf16.
# ---------------------------------------------------------------------------
def gcn_dh_kernel(x_ref, d_ref, w1_ref, b1_ref, dh_ref):
    # x_ref : (TM, F) f32   d_ref : (TM, 1) f32
    # w1_ref: (F, Hp) f32   b1_ref: (1, Hp) f32
    # dh_ref: (TM, Hp) bf16
    # NOTE: x tile is lane-sparse (F tiny) and the contraction dim underuses
    # the MXU, but this kernel is O(N*F*H) vs the O(N^2*H) aggregation, so it
    # is negligible; revisit only if F grows to >= 128.
    h = jnp.dot(x_ref[...], w1_ref[...],
                preferred_element_type=jnp.float32) + b1_ref[...]
    dh_ref[...] = (d_ref[...] * h).astype(dh_ref.dtype)


# ---------------------------------------------------------------------------
# Kernel 2: out = relu(d * (A @ dh)) @ W2 + b2, tiled over (row, A-col).
# ---------------------------------------------------------------------------
def make_agg_kernel(dh_resident, tk):
    def gcn_agg_kernel(a_ref, dh_ref, d_ref, w2_ref, b2_ref, o_ref, acc_ref):
        # a_ref : (TM, TK) bf16
        # dh_ref: (N_pad, Hp) bf16 (resident) or (TK, Hp) bf16 (streamed)
        # d_ref : (TM, 1) f32   w2_ref: (Hp, Cp) bf16   b2_ref: (1, Cp) f32
        # o_ref : (TM, Cp) f32  acc_ref: (TM, Hp) f32 VMEM scratch
        k = pl.program_id(1)

        @pl.when(k == 0)
        def _():
            acc_ref[...] = jnp.zeros_like(acc_ref)

        if dh_resident:
            start = pl.multiple_of(k * tk, tk)
            dh = dh_ref[pl.ds(start, tk), :]
        else:
            dh = dh_ref[...]
        # Native bf16 x bf16 -> f32 MXU matmul (A entries are exact 0/1).
        acc_ref[...] += jnp.dot(a_ref[...], dh,
                                preferred_element_type=jnp.float32)

        @pl.when(k == pl.num_programs(1) - 1)
        def _():
            h = jnp.maximum(d_ref[...] * acc_ref[...], 0.0)   # relu(D A D h1)
            # TODO(synk): dropout is identity (eval mode); training-mode RNG
            # dropout not reproduced here.
            o_ref[...] = jnp.dot(h.astype(jnp.bfloat16), w2_ref[...],
                                 preferred_element_type=jnp.float32) + b2_ref[...]

    return gcn_agg_kernel


# ---------------------------------------------------------------------------
# Wrapper helpers
# ---------------------------------------------------------------------------
def _round_up(a, m):
    return (a + m - 1) // m * m


def _degrees_from_edges(edge_index, n):
    """Row sums of A_hat (dedup'd edges + self loops) without an N^2 pass."""
    rows = edge_index[0].astype(jnp.int32)
    cols = edge_index[1].astype(jnp.int32)
    # Sort edge pairs so duplicates become adjacent, then count unique pairs.
    order = jnp.lexsort((cols, rows))
    r_s = rows[order]
    c_s = cols[order]
    dup = jnp.concatenate(
        [jnp.zeros((1,), jnp.bool_),
         (r_s[1:] == r_s[:-1]) & (c_s[1:] == c_s[:-1])])
    deg = jnp.zeros((n,), jnp.float32).at[r_s].add(jnp.where(dup, 0.0, 1.0))
    # +1 for the eye() self loop, unless (i, i) already appears as an edge
    # (the reference scatter is idempotent).
    self_seen = jnp.zeros((n,), jnp.float32).at[rows].max(
        (rows == cols).astype(jnp.float32))
    return deg + (1.0 - self_seen)


# ---------------------------------------------------------------------------
# Forward
# ---------------------------------------------------------------------------
def gcn_node_forward(x, edge_index, w1, b1, w2, b2):
    """x: (N, F) f32, edge_index: (2, E) int32, weights stored (in, out)."""
    n, f = x.shape
    hdim = w1.shape[1]
    cdim = w2.shape[1]

    # --- tile / pad sizes ---------------------------------------------------
    TK = 1024
    n_pad = _round_up(n, TK)
    nb = n_pad // TK
    TM = TK if nb % 2 == 0 else TK // 2     # even (>=2) row-block count
    hp = max(128, _round_up(hdim, 128))     # lane-dense hidden
    cp = max(128, _round_up(cdim, 128))     # lane-dense logits

    # --- VMEM planning (v7x: 64 MiB/TC, v5e/v6e: 128 MiB) --------------------
    try:
        vmem_cap = int(pltpu.get_tpu_info().vmem_capacity_bytes)
    except Exception:
        vmem_cap = 64 * 1024 * 1024         # conservative (v7x) fallback

    def vmem_need(dh_rows):
        return (2 * TM * TK * 2             # A tile, double buffered, bf16
                + 2 * dh_rows * hp * 2      # dh (bf16), double buffered
                + 2 * TM * 128 * 4          # d rows (lane-padded to 128)
                + 2 * hp * cp * 2           # W2 (bf16)
                + 2 * 8 * cp * 4            # b2
                + 2 * TM * cp * 4           # output tile (f32)
                + TM * hp * 4)              # f32 accumulator scratch

    dh_resident = vmem_need(n_pad) <= int(0.75 * vmem_cap)
    need = vmem_need(n_pad if dh_resident else TK)
    vmem_limit = int(min(vmem_cap, max(need + (16 << 20), 32 << 20)))

    # --- degree normalization from edge_index (no N^2 reduction) ------------
    deg = _degrees_from_edges(edge_index, n)
    deg_pad = jnp.zeros((n_pad,), jnp.float32).at[:n].set(deg)
    d = jnp.where(jnp.arange(n_pad) < n,
                  1.0 / jnp.sqrt(deg_pad + 1e-5), 0.0).reshape(n_pad, 1)

    # --- build dense A_hat (edges + self loops) in ONE scatter, bf16 ---------
    # TODO(synk): for truly large/sparse graphs, pass CSR/edge lists via
    # scalar prefetch and build A tiles in VMEM instead of densifying in HBM.
    diag = jnp.arange(n, dtype=jnp.int32)
    rows = jnp.concatenate([edge_index[0].astype(jnp.int32), diag])
    cols = jnp.concatenate([edge_index[1].astype(jnp.int32), diag])
    a_hat = jnp.zeros((n_pad, n_pad), dtype=jnp.bfloat16)
    a_hat = a_hat.at[rows, cols].set(1.0)

    # --- pad inputs / parameters ---------------------------------------------
    x_pad = jnp.zeros((n_pad, f), jnp.float32).at[:n].set(x)
    w1_pad = jnp.zeros((f, hp), jnp.float32).at[:, :hdim].set(w1)
    b1_pad = jnp.zeros((1, hp), jnp.float32).at[0, :hdim].set(b1)
    w2_pad = jnp.zeros((hp, cp), jnp.bfloat16).at[:hdim, :cdim].set(
        w2.astype(jnp.bfloat16))
    b2_pad = jnp.zeros((1, cp), jnp.float32).at[0, :cdim].set(b2)

    # --- kernel 1: dh = d * (x @ W1 + b1), emitted bf16 ----------------------
    dh = pl.pallas_call(
        gcn_dh_kernel,
        out_shape=jax.ShapeDtypeStruct((n_pad, hp), jnp.bfloat16),
        grid_spec=pltpu.PrefetchScalarGridSpec(
            num_scalar_prefetch=0,
            grid=(n_pad // TM,),
            in_specs=[
                pl.BlockSpec((TM, f), lambda i: (i, 0)),
                pl.BlockSpec((TM, 1), lambda i: (i, 0)),
                pl.BlockSpec((f, hp), lambda i: (0, 0)),
                pl.BlockSpec((1, hp), lambda i: (0, 0)),
            ],
            out_specs=pl.BlockSpec((TM, hp), lambda i: (i, 0)),
        ),
        compiler_params=pltpu.CompilerParams(
            dimension_semantics=("parallel",)),
    )(x_pad, d, w1_pad, b1_pad)

    # --- kernel 2: tiled aggregation + fused relu/W2 epilogue ----------------
    if dh_resident:
        dh_spec = pl.BlockSpec((n_pad, hp), lambda i, k: (0, 0))
        dh_stream_rows = n_pad
    else:
        dh_spec = pl.BlockSpec((TK, hp), lambda i, k: (k, 0))
        dh_stream_rows = (n_pad // TM) * n_pad

    flops = 2 * n_pad * n_pad * hp + 2 * n_pad * hp * cp
    bytes_accessed = (2 * n_pad * n_pad              # A (bf16)
                      + dh_stream_rows * hp * 2      # dh (bf16)
                      + n_pad * cp * 4)              # logits

    out_pad = pl.pallas_call(
        make_agg_kernel(dh_resident, TK),
        out_shape=jax.ShapeDtypeStruct((n_pad, cp), jnp.float32),
        grid_spec=pltpu.PrefetchScalarGridSpec(
            num_scalar_prefetch=0,
            grid=(n_pad // TM, n_pad // TK),
            in_specs=[
                pl.BlockSpec((TM, TK), lambda i, k: (i, k)),   # A tile (bf16)
                dh_spec,                                        # dh (bf16)
                pl.BlockSpec((TM, 1), lambda i, k: (i, 0)),     # d rows
                pl.BlockSpec((hp, cp), lambda i, k: (0, 0)),    # W2 (bf16)
                pl.BlockSpec((1, cp), lambda i, k: (0, 0)),     # b2
            ],
            out_specs=pl.BlockSpec((TM, cp), lambda i, k: (i, 0)),
            scratch_shapes=[pltpu.VMEM((TM, hp), jnp.float32)],
        ),
        compiler_params=pltpu.CompilerParams(
            dimension_semantics=("parallel", "arbitrary"),
            vmem_limit_bytes=vmem_limit),
        cost_estimate=pl.CostEstimate(
            flops=flops, transcendentals=0, bytes_accessed=bytes_accessed),
    )(a_hat, dh, d, w2_pad, b2_pad)

    return out_pad[:n, :cdim]


# ---------------------------------------------------------------------------
# Pure-JAX reference mirroring the PyTorch code (eval mode)
# ---------------------------------------------------------------------------
def _reference_forward(x, edge_index, w1, b1, w2, b2):
    n = x.shape[0]
    a_hat = jnp.eye(n, dtype=jnp.float32)
    a_hat = a_hat.at[edge_index[0], edge_index[1]].set(1.0)
    d_hat = jnp.diag(1.0 / jnp.sqrt(a_hat.sum(axis=1) + 1e-5))
    a_norm = d_hat @ a_hat @ d_hat
    h = jax.nn.relu(a_norm @ (x @ w1 + b1))
    return h @ w2 + b2


if __name__ == "__main__":
    key = jax.random.PRNGKey(0)
    k_x, k_e, k_w1, k_b1, k_w2, k_b2 = jax.random.split(key, 6)

    # Small graph: N nodes, F input features, H hidden, C classes, E edges
    N, F, H, C, E = 16, 8, 32, 4, 40

    x = jax.random.normal(k_x, (N, F), dtype=jnp.float32)
    edge_index = jax.random.randint(k_e, (2, E), 0, N, dtype=jnp.int32)

    # Parameters stored as (in, out) == PyTorch Linear weight transposed
    w1 = jax.random.normal(k_w1, (F, H), dtype=jnp.float32) * (1.0 / jnp.sqrt(F))
    b1 = jax.random.normal(k_b1, (H,), dtype=jnp.float32) * 0.01
    w2 = jax.random.normal(k_w2, (H, C), dtype=jnp.float32) * (1.0 / jnp.sqrt(H))
    b2 = jax.random.normal(k_b2, (C,), dtype=jnp.float32) * 0.01

    out = gcn_node_forward(x, edge_index, w1, b1, w2, b2)
    out = jax.block_until_ready(out)

    ref = _reference_forward(x, edge_index, w1, b1, w2, b2)
    assert out.shape == (N, C)
    # bf16 storage of dh / h / W2 (f32 accumulation everywhere) introduces
    # ~0.5% relative error vs the all-f32 reference.
    assert jnp.allclose(out, ref, atol=5e-2, rtol=5e-2), "mismatch vs reference"

    print("KERNEL_OK")
</pallas_src>

<mosaic_0001>
module attributes {stable_mosaic.version = 11 : i64} {
  func.func @gcn_dh_kernel(%arg0: i32, %arg1: memref<512x8xf32, #tpu.memory_space<vmem>>, %arg2: memref<512x1xf32, #tpu.memory_space<vmem>>, %arg3: memref<8x128xf32, #tpu.memory_space<vmem>>, %arg4: memref<1x128xf32, #tpu.memory_space<vmem>>, %arg5: memref<512x128xbf16, #tpu.memory_space<vmem>>) attributes {dimension_semantics = [#tpu.dimension_semantics<parallel>], iteration_bounds = array<i64: 2>, scalar_prefetch = 0 : i64, scratch_operands = 0 : i64, tpu.core_type = #tpu.core_type<tc>, window_params = [{transform_indices = @transform_0, window_bounds = array<i64: 512, 8>}, {transform_indices = @transform_1, window_bounds = array<i64: 512, 1>}, {pipeline_mode = #tpu.pipeline_mode<synchronous>, transform_indices = @transform_2, window_bounds = array<i64: 8, 128>}, {pipeline_mode = #tpu.pipeline_mode<synchronous>, transform_indices = @transform_3, window_bounds = array<i64: 1, 128>}, {transform_indices = @transform_4, window_bounds = array<i64: 512, 128>}]} {
    %c0 = arith.constant 0 : index
    %c0_0 = arith.constant 0 : index
    %0 = vector.load %arg1[%c0, %c0_0] : memref<512x8xf32, #tpu.memory_space<vmem>>, vector<512x8xf32>
    %c0_1 = arith.constant 0 : index
    %c0_2 = arith.constant 0 : index
    %1 = vector.load %arg3[%c0_1, %c0_2] : memref<8x128xf32, #tpu.memory_space<vmem>>, vector<8x128xf32>
    %cst = arith.constant dense<0.000000e+00> : vector<512x128xf32>
    %2 = tpu.matmul %0, %1, %cst {dimension_numbers = #tpu.dot_dimension_numbers<[1], [0], [0], [1], [0, 0, 1, 1], [], []>} : vector<512x8xf32>, vector<8x128xf32>, vector<512x128xf32> -> vector<512x128xf32>
    %c0_3 = arith.constant 0 : index
    %c0_4 = arith.constant 0 : index
    %3 = vector.load %arg4[%c0_3, %c0_4] : memref<1x128xf32, #tpu.memory_space<vmem>>, vector<1x128xf32>
    %4 = vector.broadcast %3 : vector<1x128xf32> to vector<512x128xf32>
    %5 = arith.addf %2, %4 : vector<512x128xf32>
    %c0_5 = arith.constant 0 : index
    %c0_6 = arith.constant 0 : index
    %6 = vector.load %arg2[%c0_5, %c0_6] : memref<512x1xf32, #tpu.memory_space<vmem>>, vector<512x1xf32>
    %7 = vector.broadcast %6 : vector<512x1xf32> to vector<512x128xf32>
    %8 = arith.mulf %7, %5 : vector<512x128xf32>
    %9 = arith.truncf %8 : vector<512x128xf32> to vector<512x128xbf16>
    %c0_7 = arith.constant 0 : index
    %c0_8 = arith.constant 0 : index
    %10 = vector.load %arg5[%c0_7, %c0_8] : memref<512x128xbf16, #tpu.memory_space<vmem>>, vector<512x128xbf16>
    tpu.vector_store %arg5[%c0_7, %c0_8], %9 {strides = array<i32>} : memref<512x128xbf16, #tpu.memory_space<vmem>>, vector<512x128xbf16>,
    return
  }
  func.func @transform_0(%arg0: i32) -> (i32, i32) {
    %c0_i32 = arith.constant 0 : i32
    %c0_i32_0 = arith.constant 0 : i32
    return %arg0, %c0_i32 : i32, i32
  }
  func.func @transform_1(%arg0: i32) -> (i32, i32) {
    %c0_i32 = arith.constant 0 : i32
    %c0_i32_0 = arith.constant 0 : i32
    return %arg0, %c0_i32 : i32, i32
  }
  func.func @transform_2(%arg0: i32) -> (i32, i32) {
    %c0_i32 = arith.constant 0 : i32
    %c0_i32_0 = arith.constant 0 : i32
    %c0_i32_1 = arith.constant 0 : i32
    return %c0_i32, %c0_i32_0 : i32, i32
  }
  func.func @transform_3(%arg0: i32) -> (i32, i32) {
    %c0_i32 = arith.constant 0 : i32
    %c0_i32_0 = arith.constant 0 : i32
    %c0_i32_1 = arith.constant 0 : i32
    return %c0_i32, %c0_i32_0 : i32, i32
  }
  func.func @transform_4(%arg0: i32) -> (i32, i32) {
    %c0_i32 = arith.constant 0 : i32
    %c0_i32_0 = arith.constant 0 : i32
    return %arg0, %c0_i32 : i32, i32
  }
}

</mosaic_0001>

<bundles_post_ra>
// kernel: tpu_custom_call.1
= control target key start
LH: loop header
LB: loop body
LE: loop exit
PB: predicated region body
PF: predicated region fallthrough
CT: control target
= control target key end

     0   :  { %9 = vsyncpa [#allocation3], 0  ;;  %s2292_s0 = inlined_call_operand.vmem [shape: f32[1024,8], index: 0, kind: input, shape index: {}]   ;;  %s2293_s1 = inlined_call_operand.vmem [shape: f32[1024,1], index: 1, kind: input, shape index: {}]   ;;  %s2294_s2 = inlined_call_operand.vmem [shape: f32[8,128], index: 2, kind: input, shape index: {}]   ;;  %s2295_s3 = inlined_call_operand.vmem [shape: f32[1,128], index: 3, kind: input, shape index: {}]   ;;  %s2296_s4 = inlined_call_operand.hbm [shape: bf16[1024,128], index: 4, kind: output, shape index: {}]  }
   0x1   :  { %11 = vsyncpa [#allocation3 + $0x1], 0  ;;  %s1769_s15 = smov 0   ;;  %s1771_s16 = smov 0  }
   0x2   :  { %s1773_s17 = smov 0   ;;  %s1775_s18 = smov 0  }
   0x3 LB: > { %s1790_s19 = sadd.s32 4294967295, %s1739_s18   ;;  %s1358_s20 = sadd.s32 4294967294, %s1739_s18   ;;  %s1739_s18 = sphi %s1775_s18, %s2302_s18   ;;  %s1735_s17 = sphi %s1773_s17, %s2301_s17   ;;  %s1731_s16 = sphi %s1771_s16, %s2300_s16   ;;  %s1727_s15 = sphi %s1769_s15, %s2299_s15  }
   0x4   : > { %s1794_s21 = sadd.s32 1, %s1739_s18   ;;  %s118_s22 = sadd.s32 1, %s1735_s17 }
   0x5   : > { %s115_s23 = ssub.s32 %s1739_s18, %s1794_s21  ;;  %p128_p0 = scmp.ne.s32.totalorder %s1735_s17, %s1731_s16 }
   0x6   : > { %p116_p1 = scmp.eq.s32.totalorder %s115_s23, 0  ;;  %p129_p2 = scmp.eq.s32.totalorder %s1790_s19, 1 }
   0x7   : > { %p134_p3 = scmp.ne.s32.totalorder %s1731_s16, %s1727_s15  ;;  %p135_p4 = scmp.eq.s32.totalorder %s1358_s20, 1 }
   0x8   : > { %s1805_s24 = scalar_select %p116_p1, %s1735_s17, %s118_s22  }
   0x9   : > { %p1807_p5 = por %p129_p2, %p128_p0  ;;  %p1811_p6 = por %p135_p4, %p134_p3 }
   0xa   : > { %p1361_p7 = scmp.ge.s32.totalorder %s1739_s18, 1  ;;  %p177_p8 = scmp.lt.s32.totalorder %s1739_s18, 3 }
   0xc   : > { %p178_p9 = pnand %p1361_p7, %p177_p8 }
   0xd   : > { %s1363_s29 = sshll.u32 (!%p178_p9), %s1790_s19, 6  ;;  %s205_s13 = sand.u32 (!%p178_p9), 1, %s1731_s16  }
   0xe   : > { %181 = sbr.rel (%p178_p9) target bundleno = 315 (0x13b), region = 36  ;;  %p209_p10 = scmp.lt.s32.totalorder (!%p178_p9), %s1363_s29, 127 }
   0xf   : > { %s1362_s14 = sshll.u32 (!%p178_p9), %s205_s13, 8  ;;  %s1436_s22 = sshll.u32 (!%p178_p9), %s1790_s19, 8 }
  0x10   : > { %s2051_s20 = scalar_lea.vmem (!%p178_p9), [#allocation2], %s1362_s14  ;;  %s1280_s28 = scalar_lea.hbm (!%p178_p9), %s2296_s4, %s1436_s22 }
  0x11   : > { %s1269_s19 = scalar_lea.sflag (!%p178_p9), [#allocation3], %s205_s13  ;;  %s1697_s9 = scalar_lea.hbm (!%p178_p9), %s2296_s4, 512 }
  0x13   : > { %v285_v0 = vld [vmem:[%s2294_s2] sm:$0xff]  ;;  %v1741_v1 = vmov 0   ;;  %s2304_s29 = smov (!%p209_p10, %s1363_s29), 127  ;;  %vm290_vm0 = vcmask 64512  }
  0x14   : > { %1675 = vset.pattern.permute.xlu2 %v1741_v1  ;;  %1674 = vset.pattern.permute.xlu1 %v1741_v1  ;;  %s1364_s30 = sshll.u32 %s2304_s29, 3  ;;  %s1281_s29 = sshll.u32 %s2051_s20, 4  ;;  %s1282_s29 = int_to_ptr.vmem [resolvable:$true] %s1281_s29 }
  0x15   : > { %1673 = vset.pattern.permute.xlu0 %v1741_v1  ;;  %498 = vmatpush.msra.mxu0 %v285_v0  ;;  %s1824_s7 = scalar_lea.vmem %s2293_s1, %s1364_s30  ;;  %s1829_s10 = scalar_lea.vmem %s2292_s0, %s1364_s30 }
  0x16   : > { %1628 = vmatpush.msra.mxu1 %v285_v0  ;;  %1629 = vmatpush.msra.mxu2 %v285_v0  ;;  %v696_v2 = vld [vmem:[%s1824_s7 + $0x20] sm:$0xff]  ;;  %v694_v3 = vld [vmem:[%s1824_s7 + $0x10] sm:$0xff]  ;;  %v697_v9 = vld [vmem:[%s1824_s7 + $0x28] sm:$0xff]  ;;  %s1283_s30 = sshll.u32 %s1280_s28, 4  ;;  %s1284_s30 = int_to_ptr.hbm [resolvable:$true] %s1283_s30 }
  0x17   : > { %1630 = vmatpush.msra.mxu3 %v285_v0  ;;  %v692_v4 = vld [vmem:[%s1824_s7] sm:$0xff]  ;;  %778 = vperm.xlu2 %1675, %v696_v2   ;;  %v695_v10 = vld [vmem:[%s1824_s7 + $0x18] sm:$0xff]  ;;  %v693_v11 = vld [vmem:[%s1824_s7 + $0x8] sm:$0xff]  ;;  %s1691_s5 = sshra.s32 %s1284_s30, 4  ;;  %s1692_s5 = int_to_ptr.hbm [resolvable:$true] %s1691_s5 }
  0x18   : > { %768 = vperm.xlu1 %1674, %v694_v3   ;;  %v221_v5 = vld [vmem:[%s1829_s10] sm:$0xff]  ;;  %758 = vperm.xlu0 %1673, %v692_v4   ;;  %v222_v12 = vld [vmem:[%s1829_s10 + $0x8] sm:$0xff]  ;;  %v699_v17 = vld [vmem:[%s1824_s7 + $0x38] sm:$0xff]  ;;  %s1693_s6 = scalar_lea.hbm %s1692_s5, 256  ;;  %p1698_p0 = scmp.lt.s32.totalorder %s1692_s5, %s2296_s4 }
  0x19   : > { %v237_v6 = vld [vmem:[%s1829_s10 + $0x80] sm:$0xff]  ;;  %1367 = vmatmul.msk.f32.vlgmr.msra.gmra.mxu0 %vm290_vm0, %v221_v5  ;;  %v238_v13 = vld [vmem:[%s1829_s10 + $0x88] sm:$0xff]  ;;  %v698_v18 = vld [vmem:[%s1824_s7 + $0x30] sm:$0xff]  ;;  %p1694_p11 = scmp.ne.s32.totalorder %s1692_s5, %s1693_s6  ;;  %p1699_p1 = scmp.lt.s32.totalorder %s1697_s9, %s1693_s6 }
  0x1a   : > { %v253_v7 = vld [vmem:[%s1829_s10 + $0x100] sm:$0xff]  ;;  %1383 = vmatmul.msk.f32.vlgmr.msra.gmra.mxu1 %vm290_vm0, %v237_v6  ;;  %v254_v14 = vld [vmem:[%s1829_s10 + $0x108] sm:$0xff]  ;;  %v223_v19 = vld [vmem:[%s1829_s10 + $0x10] sm:$0xff] }
  0x1b   : > { %v269_v8 = vld [vmem:[%s1829_s10 + $0x180] sm:$0xff]  ;;  %1399 = vmatmul.msk.f32.vlgmr.msra.gmra.mxu2 %vm290_vm0, %v253_v7  ;;  %v270_v15 = vld [vmem:[%s1829_s10 + $0x188] sm:$0xff]  ;;  %v239_v20 = vld [vmem:[%s1829_s10 + $0x90] sm:$0xff]  ;;  %p1695_p12 = pnand %p1694_p11, %p1807_p5  ;;  %p1700_p2 = por %p1699_p1, %p1698_p0 }
  0x1c   : > { %1415 = vmatmul.msk.f32.vlgmr.msra.gmra.mxu3 %vm290_vm0, %v269_v8  ;;  %v700_v16 = vld [vmem:[%s1824_s7 + $0x40] sm:$0xff]  ;;  %v255_v21 = vld [vmem:[%s1829_s10 + $0x110] sm:$0xff]  ;;  %v703_v23 = vld [vmem:[%s1824_s7 + $0x58] sm:$0xff] }
  0x1d   : > { %v271_v22 = vld [vmem:[%s1829_s10 + $0x190] sm:$0xff]  ;;  %v701_v25 = vld [vmem:[%s1824_s7 + $0x48] sm:$0xff]  ;;  %v224_v26 = vld [vmem:[%s1829_s10 + $0x18] sm:$0xff]  ;;  %p1696_p13 = pneg %p1695_p12 }
  0x1e   : > { %v702_v24 = vld [vmem:[%s1824_s7 + $0x50] sm:$0xff]  ;;  %v240_v27 = vld [vmem:[%s1829_s10 + $0x98] sm:$0xff]  ;;  %v705_v31 = vld [vmem:[%s1824_s7 + $0x68] sm:$0xff] }
  0x1f   : > { %783 = vperm.xlu2 %1675, %v697_v9   ;;  %v256_v28 = vld [vmem:[%s1829_s10 + $0x118] sm:$0xff]  ;;  %v706_v30 = vld [vmem:[%s1824_s7 + $0x70] sm:$0xff]  ;;  %v704_v32 = vld [vmem:[%s1824_s7 + $0x60] sm:$0xff]  ;;  %p1701_p3 = pnand %p1700_p2, %p1696_p13 }
  0x20   : > { %773 = vperm.xlu1 %1674, %v695_v10   ;;  %763 = vperm.xlu0 %1673, %v693_v11   ;;  %v272_v29 = vld [vmem:[%s1829_s10 + $0x198] sm:$0xff]  ;;  %v225_v33 = vld [vmem:[%s1829_s10 + $0x20] sm:$0xff]  ;;  %v709_v37 = vld [vmem:[%s1824_s7 + $0x88] sm:$0xff] }
  0x21   : > { %1368 = vmatmul.msk.f32.gmra.mxu0 %vm290_vm0, %v222_v12  ;;  %v241_v34 = vld [vmem:[%s1829_s10 + $0xa0] sm:$0xff]  ;;  %v707_v39 = vld [vmem:[%s1824_s7 + $0x78] sm:$0xff]  ;;  %v226_v40 = vld [vmem:[%s1829_s10 + $0x28] sm:$0xff] }
  0x22   : > { %1384 = vmatmul.msk.f32.gmra.mxu1 %vm290_vm0, %v238_v13  ;;  %v257_v35 = vld [vmem:[%s1829_s10 + $0x120] sm:$0xff]  ;;  %v242_v41 = vld [vmem:[%s1829_s10 + $0xa8] sm:$0xff]  ;;  %v711_v45 = vld [vmem:[%s1824_s7 + $0x98] sm:$0xff] }
  0x23   : > { %1400 = vmatmul.msk.f32.gmra.mxu2 %vm290_vm0, %v254_v14  ;;  %v273_v36 = vld [vmem:[%s1829_s10 + $0x1a0] sm:$0xff]  ;;  %v258_v42 = vld [vmem:[%s1829_s10 + $0x128] sm:$0xff]  ;;  %v710_v46 = vld [vmem:[%s1824_s7 + $0x90] sm:$0xff] }
  0x24   : > { %1416 = vmatmul.msk.f32.gmra.mxu3 %vm290_vm0, %v270_v15  ;;  %v708_v38 = vld [vmem:[%s1824_s7 + $0x80] sm:$0xff]  ;;  %v274_v43 = vld [vmem:[%s1829_s10 + $0x1a8] sm:$0xff]  ;;  %v227_v47 = vld [vmem:[%s1829_s10 + $0x30] sm:$0xff] }
  0x25   : > { %v712_v44 = vld [vmem:[%s1824_s7 + $0xa0] sm:$0xff]  ;;  %v243_v48 = vld [vmem:[%s1829_s10 + $0xb0] sm:$0xff]  ;;  %v715_v51 = vld [vmem:[%s1824_s7 + $0xb8] sm:$0xff] }
  0x26   : > { %v259_v49 = vld [vmem:[%s1829_s10 + $0x130] sm:$0xff]  ;;  %v713_v53 = vld [vmem:[%s1824_s7 + $0xa8] sm:$0xff]  ;;  %v228_v54 = vld [vmem:[%s1829_s10 + $0x38] sm:$0xff] }
  0x27   : > { %798 = vperm.xlu2 %1675, %v700_v16   ;;  %v275_v50 = vld [vmem:[%s1829_s10 + $0x1b0] sm:$0xff]  ;;  %v244_v55 = vld [vmem:[%s1829_s10 + $0xb8] sm:$0xff]  ;;  %v717_v59 = vld [vmem:[%s1824_s7 + $0xc8] sm:$0xff] }
  0x28   : > { %793 = vperm.xlu1 %1674, %v699_v17   ;;  %788 = vperm.xlu0 %1673, %v698_v18   ;;  %v714_v52 = vld [vmem:[%s1824_s7 + $0xb0] sm:$0xff]  ;;  %v260_v56 = vld [vmem:[%s1829_s10 + $0x138] sm:$0xff]  ;;  %v716_v60 = vld [vmem:[%s1824_s7 + $0xc0] sm:$0xff] }
  0x29   : > { %1369 = vmatmul.msk.f32.gmra.mxu0 %vm290_vm0, %v223_v19  ;;  %v276_v57 = vld [vmem:[%s1829_s10 + $0x1b8] sm:$0xff]  ;;  %v718_v58 = vld [vmem:[%s1824_s7 + $0xd0] sm:$0xff]  ;;  %v229_v61 = vld [vmem:[%s1829_s10 + $0x40] sm:$0xff] }
  0x2a   : > { %1385 = vmatmul.msk.f32.gmra.mxu1 %vm290_vm0, %v239_v20  ;;  %v245_v62 = vld [vmem:[%s1829_s10 + $0xc0] sm:$0xff]  ;;  %v721_v1 = vld [vmem:[%s1824_s7 + $0xe8] sm:$0xff]  ;;  %v719_v3 = vld [vmem:[%s1824_s7 + $0xd8] sm:$0xff] }
  0x2b   : > { %1401 = vmatmul.msk.f32.gmra.mxu2 %vm290_vm0, %v255_v21  ;;  %v261_v63 = vld [vmem:[%s1829_s10 + $0x140] sm:$0xff]  ;;  %v230_v4 = vld [vmem:[%s1829_s10 + $0x48] sm:$0xff]  ;;  %v723_v9 = vld [vmem:[%s1824_s7 + $0xf8] sm:$0xff] }
  0x2c   : > { %1417 = vmatmul.msk.f32.gmra.mxu3 %vm290_vm0, %v271_v22  ;;  %v277_v0 = vld [vmem:[%s1829_s10 + $0x1c0] sm:$0xff]  ;;  %v246_v5 = vld [vmem:[%s1829_s10 + $0xc8] sm:$0xff]  ;;  %v722_v10 = vld [vmem:[%s1824_s7 + $0xf0] sm:$0xff] }
  0x2d   : > { %v720_v2 = vld [vmem:[%s1824_s7 + $0xe0] sm:$0xff]  ;;  %v262_v6 = vld [vmem:[%s1829_s10 + $0x148] sm:$0xff]  ;;  %v231_v11 = vld [vmem:[%s1829_s10 + $0x50] sm:$0xff] }
  0x2e   : > { %v278_v7 = vld [vmem:[%s1829_s10 + $0x1c8] sm:$0xff]  ;;  %v724_v8 = vld [vmem:[%s1824_s7 + $0x100] sm:$0xff]  ;;  %v247_v12 = vld [vmem:[%s1829_s10 + $0xd0] sm:$0xff] }
  0x2f   : > { %813 = vperm.xlu2 %1675, %v703_v23   ;;  %v263_v13 = vld [vmem:[%s1829_s10 + $0x150] sm:$0xff]  ;;  %v727_v15 = vld [vmem:[%s1824_s7 + $0x118] sm:$0xff]  ;;  %v725_v17 = vld [vmem:[%s1824_s7 + $0x108] sm:$0xff] }
  0x30   : > { %808 = vperm.xlu1 %1674, %v702_v24   ;;  %803 = vperm.xlu0 %1673, %v701_v25   ;;  %v279_v14 = vld [vmem:[%s1829_s10 + $0x1d0] sm:$0xff]  ;;  %v232_v18 = vld [vmem:[%s1829_s10 + $0x58] sm:$0xff]  ;;  %v729_v24 = vld [vmem:[%s1824_s7 + $0x128] sm:$0xff] }
  0x31   : > { %1370 = vmatmul.msk.f32.gmra.mxu0 %vm290_vm0, %v224_v26  ;;  %v726_v16 = vld [vmem:[%s1824_s7 + $0x110] sm:$0xff]  ;;  %v248_v19 = vld [vmem:[%s1829_s10 + $0xd8] sm:$0xff]  ;;  %v728_v25 = vld [vmem:[%s1824_s7 + $0x120] sm:$0xff] }
  0x32   : > { %1386 = vmatmul.msk.f32.gmra.mxu1 %vm290_vm0, %v240_v27  ;;  %v264_v20 = vld [vmem:[%s1829_s10 + $0x158] sm:$0xff]  ;;  %v730_v23 = vld [vmem:[%s1824_s7 + $0x130] sm:$0xff]  ;;  %v233_v26 = vld [vmem:[%s1829_s10 + $0x60] sm:$0xff] }
  0x33   : > { %1402 = vmatmul.msk.f32.gmra.mxu2 %vm290_vm0, %v256_v28  ;;  %v280_v21 = vld [vmem:[%s1829_s10 + $0x1d8] sm:$0xff]  ;;  %v249_v27 = vld [vmem:[%s1829_s10 + $0xe0] sm:$0xff] }
  0x34   : > { %1418 = vmatmul.msk.f32.gmra.mxu3 %vm290_vm0, %v272_v29  ;;  %v265_v28 = vld [vmem:[%s1829_s10 + $0x160] sm:$0xff] }
  0x35   : > { %v281_v29 = vld [vmem:[%s1829_s10 + $0x1e0] sm:$0xff] }
  0x37   : > { %828 = vperm.xlu2 %1675, %v706_v30  }
  0x38   : > { %823 = vperm.xlu1 %1674, %v705_v31   ;;  %818 = vperm.xlu0 %1673, %v704_v32   ;;  %v733_v31 = vld [vmem:[%s1824_s7 + $0x148] sm:$0xff]  ;;  %v732_v32 = vld [vmem:[%s1824_s7 + $0x140] sm:$0xff] }
  0x39   : > { %1371 = vmatmul.msk.f32.gmra.mxu0 %vm290_vm0, %v225_v33  ;;  %v731_v33 = vld [vmem:[%s1824_s7 + $0x138] sm:$0xff] }
  0x3a   : > { %1387 = vmatmul.msk.f32.gmra.mxu1 %vm290_vm0, %v241_v34  ;;  %v234_v34 = vld [vmem:[%s1829_s10 + $0x68] sm:$0xff] }
  0x3b   : > { %1403 = vmatmul.msk.f32.gmra.mxu2 %vm290_vm0, %v257_v35  ;;  %v250_v35 = vld [vmem:[%s1829_s10 + $0xe8] sm:$0xff] }
  0x3c   : > { %1419 = vmatmul.msk.f32.gmra.mxu3 %vm290_vm0, %v273_v36  ;;  %v266_v36 = vld [vmem:[%s1829_s10 + $0x168] sm:$0xff] }
  0x3f   : > { %843 = vperm.xlu2 %1675, %v709_v37   ;;  %v282_v37 = vld [vmem:[%s1829_s10 + $0x1e8] sm:$0xff] }
  0x40   : > { %838 = vperm.xlu1 %1674, %v708_v38   ;;  %833 = vperm.xlu0 %1673, %v707_v39   ;;  %v736_v39 = vld [vmem:[%s1824_s7 + $0x160] sm:$0xff] }
  0x41   : > { %1372 = vmatmul.msk.f32.gmra.mxu0 %vm290_vm0, %v226_v40  ;;  %v735_v40 = vld [vmem:[%s1824_s7 + $0x158] sm:$0xff] }
  0x42   : > { %1388 = vmatmul.msk.f32.gmra.mxu1 %vm290_vm0, %v242_v41  ;;  %v734_v41 = vld [vmem:[%s1824_s7 + $0x150] sm:$0xff] }
  0x43   : > { %1404 = vmatmul.msk.f32.gmra.mxu2 %vm290_vm0, %v258_v42  ;;  %v235_v42 = vld [vmem:[%s1829_s10 + $0x70] sm:$0xff] }
  0x44   : > { %1420 = vmatmul.msk.f32.gmra.mxu3 %vm290_vm0, %v274_v43  ;;  %v251_v43 = vld [vmem:[%s1829_s10 + $0xf0] sm:$0xff] }
  0x47   : > { %858 = vperm.xlu2 %1675, %v712_v44   ;;  %v267_v44 = vld [vmem:[%s1829_s10 + $0x170] sm:$0xff] }
  0x48   : > { %853 = vperm.xlu1 %1674, %v711_v45   ;;  %848 = vperm.xlu0 %1673, %v710_v46   ;;  %v283_v45 = vld [vmem:[%s1829_s10 + $0x1f0] sm:$0xff] }
  0x49   : > { %1373 = vmatmul.msk.f32.gmra.mxu0 %vm290_vm0, %v227_v47 }
  0x4a   : > { %1389 = vmatmul.msk.f32.gmra.mxu1 %vm290_vm0, %v243_v48 }
  0x4b   : > { %1405 = vmatmul.msk.f32.gmra.mxu2 %vm290_vm0, %v259_v49  ;;  %v739_v49 = vld [vmem:[%s1824_s7 + $0x178] sm:$0xff] }
  0x4c   : > { %1421 = vmatmul.msk.f32.gmra.mxu3 %vm290_vm0, %v275_v50  ;;  %v738_v50 = vld [vmem:[%s1824_s7 + $0x170] sm:$0xff] }
  0x4f   : > { %873 = vperm.xlu2 %1675, %v715_v51   ;;  %v737_v51 = vld [vmem:[%s1824_s7 + $0x168] sm:$0xff] }
  0x50   : > { %868 = vperm.xlu1 %1674, %v714_v52   ;;  %863 = vperm.xlu0 %1673, %v713_v53   ;;  %v236_v52 = vld [vmem:[%s1829_s10 + $0x78] sm:$0xff] }
  0x51   : > { %1374 = vmatmul.msk.f32.gmra.mxu0 %vm290_vm0, %v228_v54  ;;  %v252_v53 = vld [vmem:[%s1829_s10 + $0xf8] sm:$0xff] }
  0x52   : > { %1390 = vmatmul.msk.f32.gmra.mxu1 %vm290_vm0, %v244_v55  ;;  %v268_v54 = vld [vmem:[%s1829_s10 + $0x178] sm:$0xff] }
  0x53   : > { %1406 = vmatmul.msk.f32.gmra.mxu2 %vm290_vm0, %v260_v56  ;;  %v284_v55 = vld [vmem:[%s1829_s10 + $0x1f8] sm:$0xff] }
  0x54   : > { %1422 = vmatmul.msk.f32.gmra.mxu3 %vm290_vm0, %v276_v57 }
  0x57   : > { %888 = vperm.xlu2 %1675, %v718_v58  }
  0x58   : > { %883 = vperm.xlu1 %1674, %v717_v59   ;;  %878 = vperm.xlu0 %1673, %v716_v60   ;;  %v742_v59 = vld [vmem:[%s1824_s7 + $0x190] sm:$0xff]  ;;  %v741_v60 = vld [vmem:[%s1824_s7 + $0x188] sm:$0xff] }
  0x59   : > { %1375 = vmatmul.msk.f32.gmra.mxu0 %vm290_vm0, %v229_v61 }
  0x5a   : > { %1391 = vmatmul.msk.f32.gmra.mxu1 %vm290_vm0, %v245_v62  ;;  %v740_v62 = vld [vmem:[%s1824_s7 + $0x180] sm:$0xff] }
  0x5b   : > { %1407 = vmatmul.msk.f32.gmra.mxu2 %vm290_vm0, %v261_v63 }
  0x5c   : > { %1423 = vmatmul.msk.f32.gmra.mxu3 %vm290_vm0, %v277_v0  ;;  %v2027_v0 = vld [vmem:[%s2295_s3] ss:$0 sm:$0xff] }
  0x5f   : > { %903 = vperm.xlu2 %1675, %v721_v1  }
  0x60   : > { %898 = vperm.xlu1 %1674, %v720_v2   ;;  %893 = vperm.xlu0 %1673, %v719_v3  }
  0x61   : > { %1376 = vmatmul.msk.f32.gmra.mxu0 %vm290_vm0, %v230_v4 }
  0x62   : > { %1392 = vmatmul.msk.f32.gmra.mxu1 %vm290_vm0, %v246_v5 }
  0x63   : > { %1408 = vmatmul.msk.f32.gmra.mxu2 %vm290_vm0, %v262_v6  ;;  %v745_v6 = vld [vmem:[%s1824_s7 + $0x1a8] sm:$0xff] }
  0x64   : > { %1424 = vmatmul.msk.f32.gmra.mxu3 %vm290_vm0, %v278_v7  ;;  %v744_v7 = vld [vmem:[%s1824_s7 + $0x1a0] sm:$0xff] }
  0x67   : > { %918 = vperm.xlu2 %1675, %v724_v8  }
  0x68   : > { %913 = vperm.xlu1 %1674, %v723_v9   ;;  %908 = vperm.xlu0 %1673, %v722_v10   ;;  %v743_v9 = vld [vmem:[%s1824_s7 + $0x198] sm:$0xff] }
  0x69   : > { %1377 = vmatmul.msk.f32.gmra.mxu0 %vm290_vm0, %v231_v11 }
  0x6a   : > { %1393 = vmatmul.msk.f32.gmra.mxu1 %vm290_vm0, %v247_v12 }
  0x6b   : > { %1409 = vmatmul.msk.f32.gmra.mxu2 %vm290_vm0, %v263_v13 }
  0x6c   : > { %1425 = vmatmul.msk.f32.gmra.mxu3 %vm290_vm0, %v279_v14 }
  0x6f   : > { %933 = vperm.xlu2 %1675, %v727_v15  }
  0x70   : > { %928 = vperm.xlu1 %1674, %v726_v16   ;;  %923 = vperm.xlu0 %1673, %v725_v17  }
  0x71   : > { %1378 = vmatmul.msk.f32.gmra.mxu0 %vm290_vm0, %v232_v18  ;;  %v1962_v22 = vpop.permute.xlu2 %778 }
  0x72   : > { %1394 = vmatmul.msk.f32.gmra.mxu1 %vm290_vm0, %v248_v19 }
  0x73   : > { %1410 = vmatmul.msk.f32.gmra.mxu2 %vm290_vm0, %v264_v20  ;;  %v748_v20 = vld [vmem:[%s1824_s7 + $0x1c0] sm:$0xff] }
  0x74   : > { %1426 = vmatmul.msk.f32.gmra.mxu3 %vm290_vm0, %v280_v21  ;;  %v747_v21 = vld [vmem:[%s1824_s7 + $0x1b8] sm:$0xff] }
  0x77   : > { %948 = vperm.xlu2 %1675, %v730_v23  }
  0x78   : > { %943 = vperm.xlu1 %1674, %v729_v24   ;;  %938 = vperm.xlu0 %1673, %v728_v25   ;;  %v746_v24 = vld [vmem:[%s1824_s7 + $0x1b0] sm:$0xff] }
  0x79   : > { %1379 = vmatmul.msk.f32.gmra.mxu0 %vm290_vm0, %v233_v26  ;;  %v1975_v30 = vpop.permute.xlu2 %783 }
  0x7a   : > { %1395 = vmatmul.msk.f32.gmra.mxu1 %vm290_vm0, %v249_v27 }
  0x7b   : > { %1411 = vmatmul.msk.f32.gmra.mxu2 %vm290_vm0, %v265_v28 }
  0x7c   : > { %1427 = vmatmul.msk.f32.gmra.mxu3 %vm290_vm0, %v281_v29 }
  0x7f   : > { %963 = vperm.xlu2 %1675, %v733_v31  }
  0x80   : > { %958 = vperm.xlu1 %1674, %v732_v32   ;;  %953 = vperm.xlu0 %1673, %v731_v33   ;;  %v751_v33 = vld [vmem:[%s1824_s7 + $0x1d8] sm:$0xff] }
  0x81   : > { %1380 = vmatmul.msk.f32.gmra.mxu0 %vm290_vm0, %v234_v34  ;;  %v1988_v38 = vpop.permute.xlu2 %798  ;;  %v750_v34 = vld [vmem:[%s1824_s7 + $0x1d0] sm:$0xff] }
  0x82   : > { %1396 = vmatmul.msk.f32.gmra.mxu1 %vm290_vm0, %v250_v35 }
  0x83   : > { %1412 = vmatmul.msk.f32.gmra.mxu2 %vm290_vm0, %v266_v36  ;;  %v749_v36 = vld [vmem:[%s1824_s7 + $0x1c8] sm:$0xff] }
  0x84   : > { %1428 = vmatmul.msk.f32.gmra.mxu3 %vm290_vm0, %v282_v37 }
  0x87   : > { %978 = vperm.xlu2 %1675, %v736_v39  }
  0x88   : > { %973 = vperm.xlu1 %1674, %v735_v40   ;;  %968 = vperm.xlu0 %1673, %v734_v41  }
  0x89   : > { %1381 = vmatmul.msk.f32.gmra.mxu0 %vm290_vm0, %v235_v42  ;;  %v2001_v46 = vpop.permute.xlu2 %813 }
  0x8a   : > { %1397 = vmatmul.msk.f32.gmra.mxu1 %vm290_vm0, %v251_v43  ;;  %v2003_v47 = vpop.permute.xlu1 %768  ;;  %v759_v48 = vpop.permute.xlu0 %758 }
  0x8b   : > { %1413 = vmatmul.msk.f32.gmra.mxu2 %vm290_vm0, %v267_v44 }
  0x8c   : > { %1429 = vmatmul.msk.f32.gmra.mxu3 %vm290_vm0, %v283_v45 }
  0x8f   : > { %993 = vperm.xlu2 %1675, %v739_v49  }
  0x90   : > { %988 = vperm.xlu1 %1674, %v738_v50   ;;  %983 = vperm.xlu0 %1673, %v737_v51  }
  0x91   : > { %1382 = vmatmul.msk.f32.gmra.mxu0 %vm290_vm0, %v236_v52  ;;  %v2016_v56 = vpop.permute.xlu2 %828 }
  0x92   : > { %1398 = vmatmul.msk.f32.gmra.mxu1 %vm290_vm0, %v252_v53  ;;  %v2018_v57 = vpop.permute.xlu1 %773  ;;  %v764_v58 = vpop.permute.xlu0 %763 }
  0x93   : > { %1414 = vmatmul.msk.f32.gmra.mxu2 %vm290_vm0, %v268_v54 }
  0x94   : > { %1430 = vmatmul.msk.f32.gmra.mxu3 %vm290_vm0, %v284_v55  ;;  %v754_v55 = vld [vmem:[%s1824_s7 + $0x1f0] sm:$0xff] }
  0x96   : > { %v500_v61 = vpop.f32.mrf.mxu0 }
  0x97   : > { %v548_v63 = vpop.f32.mrf.mxu1  ;;  %1008 = vperm.xlu2 %1675, %v742_v59   ;;  %v501_v4 = vadd.f32 %v2027_v0, %v500_v61 }
  0x98   : > { %1003 = vperm.xlu1 %1674, %v741_v60   ;;  %998 = vperm.xlu0 %1673, %v740_v62   ;;  %v549_v39 = vadd.f32 %v2027_v0, %v548_v63 }
  0x99   : > { %v844_v1 = vpop.permute.xlu2 %843  ;;  %v1076_v13 = vmul.f32 %v759_v48, %v501_v4 }
  0x9a   : > { %v2029_v2 = vpop.permute.xlu1 %793  ;;  %v2031_v3 = vpop.permute.xlu0 %788 }
  0x9e   : > { %v2035_v5 = vpop.f32.mrf.mxu2  ;;  %v503_v8 = vpop.f32.mrf.mxu0 }
  0x9f   : > { %v2040_v10 = vpop.f32.mrf.mxu3  ;;  %v504_v11 = vadd.f32 %v2027_v0, %v503_v8  ;;  %v551_v12 = vpop.f32.mrf.mxu1  ;;  %1023 = vperm.xlu2 %1675, %v745_v6  }
  0xa0   : > { %1018 = vperm.xlu1 %1674, %v744_v7   ;;  %1013 = vperm.xlu0 %1673, %v743_v9   ;;  %v552_v40 = vadd.f32 %v2027_v0, %v551_v12 }
  0xa1   : > { %v1077_v14 = vmul.f32 %v764_v58, %v504_v11  ;;  %v2045_v15 = vpop.permute.xlu2 %858  ;;  %v753_v58 = vld [vmem:[%s1824_s7 + $0x1e8] sm:$0xff] }
  0xa2   : > { %v2047_v16 = vpop.permute.xlu1 %808  ;;  %v2049_v18 = vpop.permute.xlu0 %803  ;;  %v1093_v49 = vmul.f32 %v844_v1, %v552_v40 }
  0xa3   : > { %v1440_v17 = vpack.c.bf16 %v1077_v14, %v1076_v13  ;;  %v755_v13 = vld [vmem:[%s1824_s7 + $0x1f8] sm:$0xff] }
  0xa5   : > { %1441 = vst [vmem:[%s2051_s20] sm:$0xff] %v1440_v17  }
  0xa6   : > { %v2054_v19 = vpop.f32.mrf.mxu2  ;;  %v506_v23 = vpop.f32.mrf.mxu0 }
  0xa7   : > { %v2059_v25 = vpop.f32.mrf.mxu3  ;;  %v554_v26 = vpop.f32.mrf.mxu1  ;;  %1038 = vperm.xlu2 %1675, %v748_v20   ;;  %v507_v31 = vadd.f32 %v2027_v0, %v506_v23 }
  0xa8   : > { %1033 = vperm.xlu1 %1674, %v747_v21   ;;  %1028 = vperm.xlu0 %1673, %v746_v24   ;;  %v555_v62 = vadd.f32 %v2027_v0, %v554_v26 }
  0xa9   : > { %v2061_v27 = vpop.permute.xlu2 %873  ;;  %v1078_v43 = vmul.f32 %v2003_v47, %v507_v31  ;;  %v752_v47 = vld [vmem:[%s1824_s7 + $0x1e0] sm:$0xff] }
  0xaa   : > { %v2063_v28 = vpop.permute.xlu1 %823  ;;  %v2065_v29 = vpop.permute.xlu0 %818 }
  0xae   : > { %v2068_v32 = vpop.f32.mrf.mxu2  ;;  %v509_v35 = vpop.f32.mrf.mxu0 }
  0xaf   : > { %v2073_v37 = vpop.f32.mrf.mxu3  ;;  %v510_v41 = vadd.f32 %v2027_v0, %v509_v35  ;;  %v557_v42 = vpop.f32.mrf.mxu1  ;;  %1053 = vperm.xlu2 %1675, %v751_v33  }
  0xb0   : > { %1048 = vperm.xlu1 %1674, %v750_v34   ;;  %1043 = vperm.xlu0 %1673, %v749_v36  }
  0xb1   : > { %v1079_v44 = vmul.f32 %v2018_v57, %v510_v41  ;;  %v2080_v45 = vpop.permute.xlu2 %888  ;;  %v558_v57 = vadd.f32 %v2027_v0, %v557_v42 }
  0xb2   : > { %v839_v48 = vpop.permute.xlu1 %838  ;;  %v2082_v52 = vpop.permute.xlu0 %833 }
  0xb3   : > { %v1445_v50 = vpack.c.bf16 %v1079_v44, %v1078_v43  ;;  %v1092_v51 = vmul.f32 %v839_v48, %v549_v39 }
  0xb5   : > { %1597 = vst [vmem:[%s2051_s20 + $0x8] sm:$0xff] %v1445_v50   ;;  %v1480_v53 = vpack.c.bf16 %v1093_v49, %v1092_v51 }
  0xb6   : > { %v2085_v54 = vpop.f32.mrf.mxu2  ;;  %v512_v59 = vpop.f32.mrf.mxu0 }
  0xb7   : > { %1604 = vst [vmem:[%s2051_s20 + $0x40] sm:$0xff] %v1480_v53   ;;  %v560_v60 = vpop.f32.mrf.mxu1  ;;  %v2092_v61 = vpop.f32.mrf.mxu3  ;;  %1068 = vperm.xlu2 %1675, %v754_v55   ;;  %v513_v8 = vadd.f32 %v2027_v0, %v512_v59 }
  0xb8   : > { %1063 = vperm.xlu1 %1674, %v753_v58   ;;  %1058 = vperm.xlu0 %1673, %v752_v47   ;;  %v561_v20 = vadd.f32 %v2027_v0, %v560_v60 }
  0xb9   : > { %v2095_v6 = vpop.permute.xlu2 %903  ;;  %v1080_v23 = vmul.f32 %v1962_v22, %v513_v8 }
  0xba   : > { %v854_v63 = vpop.permute.xlu1 %853  ;;  %v849_v4 = vpop.permute.xlu0 %848  ;;  %v1096_v35 = vmul.f32 %v2045_v15, %v561_v20 }
  0xbb   : > { %v1095_v1 = vmul.f32 %v854_v63, %v558_v57  ;;  %v1094_v7 = vmul.f32 %v849_v4, %v555_v62 }
  0xbd   : > { %v1485_v11 = vpack.c.bf16 %v1095_v1, %v1094_v7 }
  0xbe   : > { %v2098_v9 = vpop.f32.mrf.mxu2  ;;  %v515_v12 = vpop.f32.mrf.mxu0 }
  0xbf   : > { %v516_v14 = vadd.f32 %v2027_v0, %v515_v12  ;;  %v563_v17 = vpop.f32.mrf.mxu1  ;;  %1605 = vst [vmem:[%s2051_s20 + $0x48] sm:$0xff] %v1485_v11   ;;  %v2107_v26 = vpop.f32.mrf.mxu3 }
  0xc0   : > { %v564_v21 = vadd.f32 %v2027_v0, %v563_v17  ;;  %1073 = vperm.xlu0 %1673, %v755_v13  }
  0xc1   : > { %v1081_v24 = vmul.f32 %v1975_v30, %v516_v14  ;;  %v919_v40 = vpop.permute.xlu2 %918 }
  0xc2   : > { %v869_v31 = vpop.permute.xlu1 %868  ;;  %v864_v34 = vpop.permute.xlu0 %863 }
  0xc3   : > { %v1450_v33 = vpack.c.bf16 %v1081_v24, %v1080_v23  ;;  %v1097_v36 = vmul.f32 %v864_v34, %v564_v21  ;;  %v606_v21 = vadd.f32 %v2027_v0, %v2085_v54  ;;  %v603_v34 = vadd.f32 %v2027_v0, %v2068_v32 }
  0xc4   : > { %v600_v54 = vadd.f32 %v2027_v0, %v2054_v19 }
  0xc5   : > { %1598 = vst [vmem:[%s2051_s20 + $0x10] sm:$0xff] %v1450_v33   ;;  %v1490_v41 = vpack.c.bf16 %v1097_v36, %v1096_v35 }
  0xc6   : > { %v2111_v39 = vpop.f32.mrf.mxu2  ;;  %v518_v42 = vpop.f32.mrf.mxu0 }
  0xc7   : > { %v566_v43 = vpop.f32.mrf.mxu1  ;;  %1606 = vst [vmem:[%s2051_s20 + $0x50] sm:$0xff] %v1490_v41   ;;  %v2114_v44 = vpop.f32.mrf.mxu3  ;;  %v519_v48 = vadd.f32 %v2027_v0, %v518_v42  ;;  %v597_v41 = vadd.f32 %v2027_v0, %v2035_v5 }
  0xc8   : > { %v567_v15 = vadd.f32 %v2027_v0, %v566_v43 }
  0xc9   : > { %v934_v55 = vpop.permute.xlu2 %933  ;;  %v1082_v59 = vmul.f32 %v2031_v3, %v519_v48 }
  0xca   : > { %v884_v22 = vpop.permute.xlu1 %883  ;;  %v879_v30 = vpop.permute.xlu0 %878  ;;  %v1098_v57 = vmul.f32 %v869_v31, %v567_v15  ;;  %v1111_v15 = vmul.f32 %v934_v55, %v606_v21 }
  0xce   : > { %v2117_v49 = vpop.f32.mrf.mxu2  ;;  %v521_v50 = vpop.f32.mrf.mxu0 }
  0xcf   : > { %v522_v51 = vadd.f32 %v2027_v0, %v521_v50  ;;  %v569_v53 = vpop.f32.mrf.mxu1  ;;  %v2130_v7 = vpop.f32.mrf.mxu3 }
  0xd0   : > { %v570_v58 = vadd.f32 %v2027_v0, %v569_v53  ;;  %v1108_v53 = vmul.f32 %v919_v40, %v597_v41  ;;  %v609_v40 = vadd.f32 %v2027_v0, %v2098_v9 }
  0xd1   : > { %v1083_v47 = vmul.f32 %v2029_v2, %v522_v51  ;;  %v2133_v13 = vpop.permute.xlu2 %948 }
  0xd2   : > { %v1099_v60 = vmul.f32 %v2061_v27, %v570_v58  ;;  %v2125_v62 = vpop.permute.xlu1 %898  ;;  %v2127_v1 = vpop.permute.xlu0 %893 }
  0xd3   : > { %v1455_v63 = vpack.c.bf16 %v1083_v47, %v1082_v59 }
  0xd4   : > { %v1495_v4 = vpack.c.bf16 %v1099_v60, %v1098_v57 }
  0xd5   : > { %1599 = vst [vmem:[%s2051_s20 + $0x18] sm:$0xff] %v1455_v63  }
  0xd6   : > { %v617_v8 = vpop.f32.mrf.mxu2  ;;  %1607 = vst [vmem:[%s2051_s20 + $0x58] sm:$0xff] %v1495_v4   ;;  %v524_v11 = vpop.f32.mrf.mxu0 }
  0xd7   : > { %v572_v12 = vpop.f32.mrf.mxu1  ;;  %v525_v27 = vadd.f32 %v2027_v0, %v524_v11  ;;  %v2143_v23 = vpop.f32.mrf.mxu3 }
  0xd8   : > { %v573_v17 = vadd.f32 %v2027_v0, %v572_v12 }
  0xd9   : > { %v1084_v35 = vmul.f32 %v1988_v38, %v525_v27  ;;  %v964_v38 = vpop.permute.xlu2 %963 }
  0xda   : > { %v2135_v3 = vpop.permute.xlu1 %913  ;;  %v2137_v2 = vpop.permute.xlu0 %908  ;;  %v1100_v42 = vmul.f32 %v879_v30, %v573_v17 }
  0xde   : > { %v620_v14 = vpop.f32.mrf.mxu2  ;;  %v527_v20 = vpop.f32.mrf.mxu0 }
  0xdf   : > { %v528_v24 = vadd.f32 %v2027_v0, %v527_v20  ;;  %v575_v31 = vpop.f32.mrf.mxu1  ;;  %v2161_v30 = vpop.f32.mrf.mxu3 }
  0xe0   : > { %v576_v33 = vadd.f32 %v2027_v0, %v575_v31 }
  0xe1   : > { %v1085_v36 = vmul.f32 %v2049_v18, %v528_v24  ;;  %v2166_v27 = vpop.permute.xlu2 %978 }
  0xe2   : > { %v1101_v43 = vmul.f32 %v884_v22, %v576_v33  ;;  %v929_v48 = vpop.permute.xlu1 %928  ;;  %v924_v51 = vpop.permute.xlu0 %923  ;;  %v612_v22 = vadd.f32 %v2027_v0, %v2111_v39  ;;  %v621_v39 = vadd.f32 %v2027_v0, %v620_v14  ;;  %v615_v33 = vadd.f32 %v2027_v0, %v2117_v49 }
  0xe3   : > { %v1460_v50 = vpack.c.bf16 %v1085_v36, %v1084_v35  ;;  %v1110_v32 = vmul.f32 %v929_v48, %v603_v34  ;;  %v1109_v18 = vmul.f32 %v924_v51, %v600_v54  ;;  %v618_v34 = vadd.f32 %v2027_v0, %v617_v8 }
  0xe4   : > { %v1500_v58 = vpack.c.bf16 %v1101_v43, %v1100_v42 }
  0xe5   : > { %1600 = vst [vmem:[%s2051_s20 + $0x20] sm:$0xff] %v1460_v50   ;;  %v1525_v59 = vpack.c.bf16 %v1111_v15, %v1110_v32  ;;  %v1520_v47 = vpack.c.bf16 %v1109_v18, %v1108_v53  ;;  %v1114_v50 = vmul.f32 %v2133_v13, %v615_v33 }
  0xe6   : > { %v623_v5 = vpop.f32.mrf.mxu2  ;;  %1608 = vst [vmem:[%s2051_s20 + $0x60] sm:$0xff] %v1500_v58   ;;  %v530_v57 = vpop.f32.mrf.mxu0 }
  0xe7   : > { %1613 = vst [vmem:[%s2051_s20 + $0x88] sm:$0xff] %v1525_v59   ;;  %v578_v19 = vpop.f32.mrf.mxu1  ;;  %v531_v11 = vadd.f32 %v2027_v0, %v530_v57  ;;  %v624_v24 = vadd.f32 %v2027_v0, %v623_v5  ;;  %v2181_v48 = vpop.f32.mrf.mxu3 }
  0xe8   : > { %1612 = vst [vmem:[%s2051_s20 + $0x80] sm:$0xff] %v1520_v47   ;;  %v579_v17 = vadd.f32 %v2027_v0, %v578_v19 }
  0xe9   : > { %v1086_v36 = vmul.f32 %v2047_v16, %v531_v11  ;;  %v1117_v43 = vmul.f32 %v964_v38, %v624_v24  ;;  %v2188_v58 = vpop.permute.xlu2 %993 }
  0xea   : > { %v944_v55 = vpop.permute.xlu1 %943  ;;  %v939_v63 = vpop.permute.xlu0 %938  ;;  %v1102_v14 = vmul.f32 %v2080_v45, %v579_v17 }
  0xeb   : > { %v1113_v60 = vmul.f32 %v944_v55, %v612_v22  ;;  %v1112_v4 = vmul.f32 %v939_v63, %v609_v40 }
  0xed   : > { %v1530_v20 = vpack.c.bf16 %v1113_v60, %v1112_v4 }
  0xee   : > { %v626_v12 = vpop.f32.mrf.mxu2  ;;  %v533_v21 = vpop.f32.mrf.mxu0 }
  0xef   : > { %v534_v9 = vadd.f32 %v2027_v0, %v533_v21  ;;  %v581_v31 = vpop.f32.mrf.mxu1  ;;  %1614 = vst [vmem:[%s2051_s20 + $0x90] sm:$0xff] %v1530_v20   ;;  %v627_v18 = vadd.f32 %v2027_v0, %v626_v12  ;;  %v2192_v57 = vpop.f32.mrf.mxu3 }
  0xf0   : > { %v582_v35 = vadd.f32 %v2027_v0, %v581_v31 }
  0xf1   : > { %v1087_v41 = vmul.f32 %v2001_v46, %v534_v9  ;;  %v1009_v20 = vpop.permute.xlu2 %1008 }
  0xf2   : > { %v1103_v54 = vmul.f32 %v2127_v1, %v582_v35  ;;  %v959_v42 = vpop.permute.xlu1 %958  ;;  %v954_v15 = vpop.permute.xlu0 %953 }
  0xf3   : > { %v1465_v49 = vpack.c.bf16 %v1087_v41, %v1086_v36  ;;  %v1116_v8 = vmul.f32 %v959_v42, %v621_v39  ;;  %v1115_v16 = vmul.f32 %v954_v15, %v618_v34 }
  0xf4   : > { %v1505_v32 = vpack.c.bf16 %v1103_v54, %v1102_v14  ;;  %v645_v54 = vadd.f32 %v2027_v0, %v2040_v10 }
  0xf5   : > { %1601 = vst [vmem:[%s2051_s20 + $0x28] sm:$0xff] %v1465_v49   ;;  %v1540_v51 = vpack.c.bf16 %v1117_v43, %v1116_v8  ;;  %v1535_v45 = vpack.c.bf16 %v1115_v16, %v1114_v50 }
  0xf6   : > { %v629_v46 = vpop.f32.mrf.mxu2  ;;  %1609 = vst [vmem:[%s2051_s20 + $0x68] sm:$0xff] %v1505_v32   ;;  %v536_v53 = vpop.f32.mrf.mxu0 }
  0xf7   : > { %1616 = vst [vmem:[%s2051_s20 + $0xa0] sm:$0xff] %v1540_v51   ;;  %v630_v1 = vadd.f32 %v2027_v0, %v629_v46  ;;  %v584_v38 = vpop.f32.mrf.mxu1  ;;  %v537_v19 = vadd.f32 %v2027_v0, %v536_v53  ;;  %v677_v41 = vpop.f32.mrf.mxu3  ;;  %v657_v53 = vadd.f32 %v2027_v0, %v2107_v26 }
  0xf8   : > { %1615 = vst [vmem:[%s2051_s20 + $0x98] sm:$0xff] %v1535_v45   ;;  %v585_v40 = vadd.f32 %v2027_v0, %v584_v38 }
  0xf9   : > { %v1088_v12 = vmul.f32 %v2065_v29, %v537_v19  ;;  %v1024_v15 = vpop.permute.xlu2 %1023 }
  0xfa   : > { %v974_v59 = vpop.permute.xlu1 %973  ;;  %v969_v5 = vpop.permute.xlu0 %968  ;;  %v1104_v21 = vmul.f32 %v2125_v62, %v585_v40 }
  0xfb   : > { %v1119_v13 = vmul.f32 %v974_v59, %v630_v1  ;;  %v1118_v47 = vmul.f32 %v969_v5, %v627_v18  ;;  %v660_v1 = vadd.f32 %v2027_v0, %v2114_v44  ;;  %v654_v5 = vadd.f32 %v2027_v0, %v2092_v61 }
  0xfd   : > { %v1545_v55 = vpack.c.bf16 %v1119_v13, %v1118_v47  ;;  %v651_v13 = vadd.f32 %v2027_v0, %v2073_v37  ;;  %v1129_v44 = vmul.f32 %v1024_v15, %v660_v1 }
  0xfe   : > { %v632_v22 = vpop.f32.mrf.mxu2  ;;  %v539_v60 = vpop.f32.mrf.mxu0 }
  0xff   : > { %v540_v63 = vadd.f32 %v2027_v0, %v539_v60  ;;  %v587_v4 = vpop.f32.mrf.mxu1  ;;  %1617 = vst [vmem:[%s2051_s20 + $0xa8] sm:$0xff] %v1545_v55   ;;  %v633_v33 = vadd.f32 %v2027_v0, %v632_v22  ;;  %v680_v38 = vpop.f32.mrf.mxu3  ;;  %v1126_v55 = vmul.f32 %v1009_v20, %v651_v13  ;;  %v663_v20 = vadd.f32 %v2027_v0, %v2130_v7 }
 0x100   : > { %v588_v11 = vadd.f32 %v2027_v0, %v587_v4  ;;  %v669_v7 = vadd.f32 %v2027_v0, %v2161_v30  ;;  %v681_v30 = vadd.f32 %v2027_v0, %v680_v38 }
 0x101   : > { %v1089_v17 = vmul.f32 %v2063_v28, %v540_v63  ;;  %v1120_v14 = vmul.f32 %v2166_v27, %v633_v33  ;;  %v1039_v4 = vpop.permute.xlu2 %1038 }
 0x102   : > { %v1105_v39 = vmul.f32 %v2095_v6, %v588_v11  ;;  %v989_v24 = vpop.permute.xlu1 %988  ;;  %v984_v31 = vpop.permute.xlu0 %983  ;;  %v648_v6 = vadd.f32 %v2027_v0, %v2059_v25 }
 0x103   : > { %v1470_v9 = vpack.c.bf16 %v1089_v17, %v1088_v12  ;;  %v666_v17 = vadd.f32 %v2027_v0, %v2143_v23  ;;  %v675_v23 = vadd.f32 %v2027_v0, %v2192_v57 }
 0x104   : > { %v1510_v34 = vpack.c.bf16 %v1105_v39, %v1104_v21 }
 0x105   : > { %1602 = vst [vmem:[%s2051_s20 + $0x30] sm:$0xff] %v1470_v9  }
 0x106   : > { %v635_v35 = vpop.f32.mrf.mxu2  ;;  %1610 = vst [vmem:[%s2051_s20 + $0x70] sm:$0xff] %v1510_v34   ;;  %v542_v29 = vpop.f32.mrf.mxu0 }
 0x107   : > { %v636_v36 = vadd.f32 %v2027_v0, %v635_v35  ;;  %v590_v28 = vpop.f32.mrf.mxu1  ;;  %v543_v32 = vadd.f32 %v2027_v0, %v542_v29  ;;  %v683_v9 = vpop.f32.mrf.mxu3 }
 0x108   : > { %v591_v27 = vadd.f32 %v2027_v0, %v590_v28  ;;  %v684_v57 = vadd.f32 %v2027_v0, %v683_v9 }
 0x109   : > { %v1121_v62 = vmul.f32 %v984_v31, %v636_v36  ;;  %v1090_v18 = vmul.f32 %v2016_v56, %v543_v32  ;;  %v1054_v36 = vpop.permute.xlu2 %1053 }
 0x10a   : > { %v1004_v43 = vpop.permute.xlu1 %1003  ;;  %v999_v8 = vpop.permute.xlu0 %998  ;;  %v1106_v47 = vmul.f32 %v2137_v2, %v591_v27 }
 0x10b   : > { %v1550_v42 = vpack.c.bf16 %v1121_v62, %v1120_v14  ;;  %v1125_v49 = vmul.f32 %v1004_v43, %v648_v6  ;;  %v1124_v50 = vmul.f32 %v999_v8, %v645_v54  ;;  %v1132_v6 = vmul.f32 %v1039_v4, %v669_v7 }
 0x10d   : > { %1618 = vst [vmem:[%s2051_s20 + $0xb0] sm:$0xff] %v1550_v42   ;;  %v1560_v51 = vpack.c.bf16 %v1125_v49, %v1124_v50 }
 0x10e   : > { %v638_v16 = vpop.f32.mrf.mxu2  ;;  %v545_v46 = vpop.f32.mrf.mxu0 }
 0x10f   : > { %v546_v25 = vadd.f32 %v2027_v0, %v545_v46  ;;  %v593_v45 = vpop.f32.mrf.mxu1  ;;  %1620 = vst [vmem:[%s2051_s20 + $0xc0] sm:$0xff] %v1560_v51  }
 0x110   : > { %v594_v10 = vadd.f32 %v2027_v0, %v593_v45 }
 0x111   : > { %v1091_v59 = vmul.f32 %v2082_v52, %v546_v25  ;;  %v639_v52 = vadd.f32 %v2027_v0, %v638_v16  ;;  %v1069_v51 = vpop.permute.xlu2 %1068 }
 0x112   : > { %v1107_v26 = vmul.f32 %v2135_v3, %v594_v10  ;;  %v1019_v19 = vpop.permute.xlu1 %1018  ;;  %v1014_v56 = vpop.permute.xlu0 %1013 }
 0x113   : > { %v1475_v22 = vpack.c.bf16 %v1091_v59, %v1090_v18  ;;  %v1128_v40 = vmul.f32 %v1019_v19, %v657_v53  ;;  %v1127_v37 = vmul.f32 %v1014_v56, %v654_v5  ;;  %v1122_v11 = vmul.f32 %v989_v24, %v639_v52 }
 0x114   : > { %v1515_v60 = vpack.c.bf16 %v1107_v26, %v1106_v47  ;;  %v678_v24 = vadd.f32 %v2027_v0, %v677_v41  ;;  %v686_v41 = vpop.f32.mrf.mxu3 }
 0x115   : > { %1603 = vst [vmem:[%s2051_s20 + $0x38] sm:$0xff] %v1475_v22   ;;  %v1570_v63 = vpack.c.bf16 %v1129_v44, %v1128_v40  ;;  %v1565_v2 = vpack.c.bf16 %v1127_v37, %v1126_v55  ;;  %v687_v16 = vadd.f32 %v2027_v0, %v686_v41 }
 0x116   : > { %v641_v61 = vpop.f32.mrf.mxu2  ;;  %1611 = vst [vmem:[%s2051_s20 + $0x78] sm:$0xff] %v1515_v60   ;;  %v1135_v28 = vmul.f32 %v1054_v36, %v678_v24 }
 0x117   : > { %v642_v3 = vadd.f32 %v2027_v0, %v641_v61  ;;  %1622 = vst [vmem:[%s2051_s20 + $0xd0] sm:$0xff] %v1570_v63   ;;  %v1138_v25 = vmul.f32 %v1069_v51, %v687_v16 }
 0x118   : > { %1621 = vst [vmem:[%s2051_s20 + $0xc8] sm:$0xff] %v1565_v2  }
 0x119   : > { %v1123_v12 = vmul.f32 %v2188_v58, %v642_v3  ;;  %v672_v58 = vadd.f32 %v2027_v0, %v2181_v48 }
 0x11a   : > { %v1034_v39 = vpop.permute.xlu1 %1033  ;;  %v1029_v33 = vpop.permute.xlu0 %1028 }
 0x11b   : > { %v1555_v21 = vpack.c.bf16 %v1123_v12, %v1122_v11  ;;  %v1131_v31 = vmul.f32 %v1034_v39, %v666_v17  ;;  %v1130_v34 = vmul.f32 %v1029_v33, %v663_v20 }
 0x11c   : > { %v689_v50 = vpop.f32.mrf.mxu3 }
 0x11d   : > { %1619 = vst [vmem:[%s2051_s20 + $0xb8] sm:$0xff] %v1555_v21   ;;  %v1575_v35 = vpack.c.bf16 %v1131_v31, %v1130_v34  ;;  %v690_v27 = vadd.f32 %v2027_v0, %v689_v50 }
 0x11f   : > { %1623 = vst [vmem:[%s2051_s20 + $0xd8] sm:$0xff] %v1575_v35  }
 0x122   : > { %v1049_v29 = vpop.permute.xlu1 %1048  ;;  %v1044_v62 = vpop.permute.xlu0 %1043 }
 0x123   : > { %v1134_v14 = vmul.f32 %v1049_v29, %v675_v23  ;;  %v1133_v54 = vmul.f32 %v1044_v62, %v672_v58 }
 0x125   : > { %v1585_v42 = vpack.c.bf16 %v1135_v28, %v1134_v14  ;;  %v1580_v43 = vpack.c.bf16 %v1133_v54, %v1132_v6 }
 0x127   : > { %1625 = vst [vmem:[%s2051_s20 + $0xe8] sm:$0xff] %v1585_v42  }
 0x128   : > { %1624 = vst [vmem:[%s2051_s20 + $0xe0] sm:$0xff] %v1580_v43  }
 0x12a   : > { %v1064_v49 = vpop.permute.xlu1 %1063  ;;  %v1059_v8 = vpop.permute.xlu0 %1058 }
 0x12b   : > { %v1137_v48 = vmul.f32 %v1064_v49, %v684_v57  ;;  %v1136_v15 = vmul.f32 %v1059_v8, %v681_v30 }
 0x12d   : > { %v1590_v32 = vpack.c.bf16 %v1137_v48, %v1136_v15 }
 0x12f   : > { %1626 = vst [vmem:[%s2051_s20 + $0xf0] sm:$0xff] %v1590_v32  }
 0x132   : > { %v1074_v46 = vpop.permute.xlu0 %1073 }
 0x133   : > { %v1139_v45 = vmul.f32 %v1074_v46, %v690_v27 }
 0x135   : > { %v1595_v10 = vpack.c.bf16 %v1139_v45, %v1138_v25 }
 0x137   : > { %1627 = vst [vmem:[%s2051_s20 + $0xf8] sm:$0xff] %v1595_v10  }
 0x138   : > { %1704 = shalt.err (!%p1701_p3)
}
 0x139   : > { %s1742_s12 = smov 64   ;;  %s1743_s13 = smov 4  }
 0x13a   : > { %1631 = dma.vmem_to_hbm [thread:$0]  (%p1807_p5), %s1282_s29, 4096, %s1284_s30, %s1269_s19, %s1742_s12, %s1742_s12, %s1743_s13  }
 0x13b PF: > { %p1637_p4 = scmp.ge.s32.totalorder %s1739_s18, 2  ;;  %s1298_s14 = sand.u32 1, %s1727_s15  }
 0x13c   : > { %s1299_s20 = scalar_lea.sflag [#allocation3], %s1298_s14 }
 0x13d   : > { %p1634_p7 = pnand %p1637_p4, %p1811_p6 }
 0x13f   : > { %p1635_p8 = pneg %p1634_p7 }
 0x141   : > { %1722 = dma.done.wait (%p1635_p8), %s1299_s20, 4096  }
 0x142   : > { %1724 = vsyncadd (%p1635_p8), %s1299_s20, 4294963200  ;;  %p14_p9 = scmp.ge.s32.totalorder %s1794_s21, 4   ;;  %s2299_s15 = smov %s1731_s16 }
 0x143   : > { %s2300_s16 = smov %s1735_s17  ;;  %s2301_s17 = smov %s1805_s24 }
 0x144   : > { %s2302_s18 = smov %s1794_s21  ;;  %16 = sbr.rel (!%p14_p9) target bundleno = 3 (0x3), region = 74 }
 0x149   :  { %1305 = vsyncpa [#allocation3], 1 }
 0x14a   :  { %1307 = vsyncpa [#allocation3 + $0x1], 1 }

</bundles_post_ra>
